<compile_context>
chip_gen: v5e
topology: v5e:2x2
jax: 0.10.0
libtpu: 0.0.40
codegen_flags: <defaults>
</compile_context>

<pallas_src>
import math

import jax
import jax.numpy as jnp
from jax.experimental import pallas as pl
from jax.experimental.pallas import tpu as pltpu

USED_APIS = [
    'torch.Tensor.fill_', 'torch.Tensor.frac', 'torch.Tensor.arccos_',
    'torch.Tensor.heaviside', 'torch.std_mean', 'torch.nn.Unfold',
    'torch.nn.GroupNorm', 'torch.nn.PixelShuffle', 'toech.nn.LogSoftmax',
    'torch.package.PackageExporter'
]


# ----------------------------------------------------------------------------
# Single kernel: whole forward, constant-folded at trace time, scalars to SMEM.
# ----------------------------------------------------------------------------
def fused_forward_kernel(x_hbm_ref, out_ref):
    # x_hbm_ref: raw HBM ref (memory_space=pl.ANY). Only its SHAPE is used
    # (to derive the post-Unfold element count); the data is never read because
    # GroupNorm/Unfold/PixelShuffle/LogSoftmax are dead code w.r.t. the output.
    # out_ref: (2,) f32 in SMEM -> out_ref[0] = std, out_ref[1] = mean.
    N, C, H, W = x_hbm_ref.shape
    OH, OW = H - 2, W - 2                    # Unfold(kernel_size=3)
    K, L = C * 9, OH * OW                    # PixelShuffle(1) == identity
    n = N * K * L                            # element count seen by std_mean

    # ---- constant chain, folded at trace time on a scalar ------------------
    fill_val = 1.0                                           # x.fill_(1.0)
    frac = fill_val - math.trunc(fill_val)                   # x.frac() -> 0.0
    clamped = min(max(frac, -1.0), 1.0)                      # clamp(-1, 1)
    acos = math.acos(clamped)                                # .arccos_() -> pi/2
    # heaviside(v, v): acos output is in [0, pi], so v < 0 is unreachable.
    heav = acos if acos == 0.0 else 1.0                      # -> 1.0

    # torch.std_mean over n identical values `heav`: closed-form sums.
    s = n * heav
    ss = n * heav * heav
    mean = s / n                                             # -> 1.0
    var = max(ss - s * mean, 0.0) / (n - 1)                  # -> 0.0 exactly
    std = math.sqrt(var)

    out_ref[0] = jnp.float32(std)
    out_ref[1] = jnp.float32(mean)


# ----------------------------------------------------------------------------
# Wrapper
# ----------------------------------------------------------------------------
def preprocess_and_calculate(x, gn_weight=None, gn_bias=None):
    # gn_weight / gn_bias are accepted for signature parity with the module but
    # are dead parameters (fill_(1.0) discards the GroupNorm output), so they
    # are not passed to the kernel at all.
    del gn_weight, gn_bias

    out = pl.pallas_call(
        fused_forward_kernel,
        out_shape=jax.ShapeDtypeStruct((2,), jnp.float32),
        in_specs=[
            # Raw HBM ref, never read -> no input DMA is issued.
            pl.BlockSpec(memory_space=pl.ANY),
        ],
        out_specs=pl.BlockSpec(memory_space=pltpu.MemorySpace.SMEM),
    )(x)

    output = (out[0], out[1])                # (std, mean) like torch.std_mean
    used_apis_sorted = sorted(set(USED_APIS), key=USED_APIS.index)
    return output, used_apis_sorted


# ----------------------------------------------------------------------------
if __name__ == "__main__":
    key = jax.random.PRNGKey(0)
    x = jax.random.normal(key, (2, 3, 16, 16), dtype=jnp.float32)

    # GroupNorm default affine init (weight=1, bias=0); dead params here.
    gn_weight = jnp.ones((3,), dtype=jnp.float32)
    gn_bias = jnp.zeros((3,), dtype=jnp.float32)

    (std, mean), apis = preprocess_and_calculate(x, gn_weight, gn_bias)
    std, mean = jax.block_until_ready((std, mean))

    # After fill_(1.0): frac=0, arccos(0)=pi/2>0, heaviside=1 everywhere
    # => std_mean == (0.0, 1.0) regardless of input.
    assert abs(float(mean) - 1.0) < 1e-6, float(mean)
    assert abs(float(std)) < 1e-6, float(std)
    assert len(apis) == 10

    print("KERNEL_OK")
</pallas_src>

<mosaic_0001>
module attributes {stable_mosaic.version = 11 : i64} {
  func.func @fused_forward_kernel(%arg0: memref<2x3x16x16xf32, #tpu.memory_space<any>>, %arg1: memref<2xf32, #tpu.memory_space<smem>>) attributes {dimension_semantics = [], scalar_prefetch = 0 : i64, scratch_operands = 0 : i64, tpu.core_type = #tpu.core_type<tc>} {
    %cst = arith.constant 0.000000e+00 : f32
    %c0 = arith.constant 0 : index
    %0 = memref.load %arg1[%c0] : memref<2xf32, #tpu.memory_space<smem>>
    memref.store %cst, %arg1[%c0] : memref<2xf32, #tpu.memory_space<smem>>
    %cst_0 = arith.constant 1.000000e+00 : f32
    %c1 = arith.constant 1 : index
    %1 = memref.load %arg1[%c1] : memref<2xf32, #tpu.memory_space<smem>>
    memref.store %cst_0, %arg1[%c1] : memref<2xf32, #tpu.memory_space<smem>>
    return
  }
}

</mosaic_0001>

<bundles_post_ra>
// kernel: tpu_custom_call.1
= control target key start
LH: loop header
LB: loop body
LE: loop exit
PB: predicated region body
PF: predicated region fallthrough
CT: control target
= control target key end

     0   :  { %6 = vsyncpa [#allocation3], 0  ;;  %s43_s6 = smov 0.0   ;;  %s44_s10 = smov 1.0   ;;  %s59_s0 = inlined_call_operand.hbm [shape: f32[2,3,16,16], index: 0, kind: input, shape index: {}]   ;;  %s60_s1 = inlined_call_operand.hbm [shape: f32[2], index: 1, kind: output, shape index: {}]  }
   0x1   :  { %8 = sst [smem:[#allocation2]] %s43_s6  ;;  %s16_s9 = sshll.u32 %s60_s1, 4  ;;  %s17_s9 = int_to_ptr.hbm [resolvable:$true] %s16_s9 }
   0x2   :  { %10 = sst [smem:[#allocation2 + $0x1]] %s44_s10  ;;  %s45_s11 = smov [#allocation2]  }
   0x3   :  { %19 = dma.smem_to_hbm %s45_s11, 16, %s17_s9, [#allocation3]  }
   0x4   :  { %41 = dma.done.wait [#allocation3], 16  }
   0x5   :  { %42 = vsyncadd [#allocation3], 4294967280 }
   0x6   :  { %24 = sfence }
   0x7   :  { %25 = vsyncpa [#allocation3], 1 }

</bundles_post_ra>
